<compile_context>
chip_gen: v7x
topology: tpu7x:2x2x1
jax: 0.10.0
libtpu: 0.0.40
codegen_flags: <defaults>
</compile_context>

<pallas_src>
import functools

import jax
import jax.numpy as jnp
import numpy as np
from jax.experimental import pallas as pl
from jax.experimental.pallas import tpu as pltpu

EMB_DIM = 64
N_CLASSES = 6
OUT_LANES = 128   # lane-dense padded width of the dense-head output


def _lstm_encoder_kernel(gx_ref, whh_ref, wd_ref, bd_ref, out_ref,
                         h_ref, c_ref, pooled_ref, *, t_blk, unroll):
    # gx_ref     : [T_BLK, L, 4H] precomputed x_t @ W_ih + (b_ih + b_hh) for this block
    # whh_ref    : [H, 4H]        W_hh (pre-transposed), resident constant block
    # wd_ref     : [H, 128]       dense weight, zero-padded past column 6 (lane-dense)
    # bd_ref     : [1, 128]       dense bias, zero-padded
    # out_ref    : [B_pad, 128]   resident output block (written once, on the last block)
    # h_ref/c_ref: [L, H]         VMEM scratch carrying LSTM state across grid blocks
    # pooled_ref : [B_pad, H]     VMEM scratch with the per-step max over L
    blk = pl.program_id(0)
    n_blk = pl.num_programs(0)
    H = whh_ref.shape[0]

    @pl.when(blk == 0)
    def _init():
        h_ref[...] = jnp.zeros_like(h_ref)
        c_ref[...] = jnp.zeros_like(c_ref)

    whh = whh_ref[...]                                  # hoisted resident weight [H, 4H]
    h0 = h_ref[...]
    c0 = c_ref[...]
    pooled0 = jnp.zeros((t_blk, H), jnp.float32)
    row_ids = jax.lax.broadcasted_iota(jnp.int32, (t_blk, H), 0)

    def step(i, carry):
        h, c, pooled = carry
        # Recurrent part only: input-to-hidden matmul precomputed outside the kernel.
        gates = gx_ref[i] + jnp.dot(h, whh, preferred_element_type=jnp.float32)  # [L, 4H]
        i_g = jax.nn.sigmoid(gates[:, 0 * H:1 * H])
        f_g = jax.nn.sigmoid(gates[:, 1 * H:2 * H])
        g_g = jnp.tanh(gates[:, 2 * H:3 * H])
        o_g = jax.nn.sigmoid(gates[:, 3 * H:4 * H])
        c = f_g * c + i_g * g_g
        h = o_g * jnp.tanh(c)
        # GlobalMaxPooling(dim=1): max over the LSTM "batch" axis (= sequence position L).
        row = jnp.max(h, axis=0, keepdims=True)                                  # [1, H]
        pooled = jnp.where(row_ids == i, jnp.broadcast_to(row, (t_blk, H)), pooled)
        return h, c, pooled

    h_f, c_f, pooled_blk = jax.lax.fori_loop(0, t_blk, step, (h0, c0, pooled0),
                                             unroll=unroll)

    # Spill state once per block; store the pooled rows as one sublane-aligned tile.
    h_ref[...] = h_f
    c_ref[...] = c_f
    row0 = pl.multiple_of(blk * t_blk, t_blk)
    pooled_ref[pl.ds(row0, t_blk), :] = pooled_blk

    @pl.when(blk == n_blk - 1)
    def _finalize():
        act = jnp.maximum(pooled_ref[...], 0.0)                          # ReLU [B_pad, H]
        out_ref[...] = (jnp.dot(act, wd_ref[...],
                                preferred_element_type=jnp.float32)
                        + bd_ref[...])                                   # [B_pad, 128]


def comments_lstm_encoder(text_ix, params):
    # Fused embedding gather + input matmul: gather rows of the precomputed per-token gate
    # table instead of materializing the [B, L, 64] activation and redoing x @ W_ih inside
    # the serial recurrence.
    gates_x = jnp.take(params["emb_gates"], text_ix, axis=0)     # [B, L, 4H] float32
    B, L, G4 = gates_x.shape
    H = params["whh_t"].shape[0]

    # Timestep-block size: multiple of 8 (sublane alignment), capped at 128.
    t_blk = min(128, ((B + 7) // 8) * 8)
    n_blk = -(-B // t_blk)
    b_pad = n_blk * t_blk
    if b_pad != B:
        # Padded trailing timesteps run on zero gate inputs and only touch pooled/out rows
        # that are sliced off below; they cannot affect the real rows (padding is at the end).
        gates_x = jnp.pad(gates_x, ((0, b_pad - B), (0, 0), (0, 0)))
    unroll = min(t_blk, 8)

    kernel = functools.partial(_lstm_encoder_kernel, t_blk=t_blk, unroll=unroll)

    cost = pl.CostEstimate(
        flops=2 * b_pad * L * H * G4 + 2 * b_pad * H * OUT_LANES,
        transcendentals=5 * b_pad * L * H,
        bytes_accessed=(gates_x.size + params["whh_t"].size
                        + params["wd_pad"].size + params["bd_pad"].size
                        + b_pad * OUT_LANES) * 4,
    )

    # VMEM budget for the blocked design (double-buffered gates blocks + resident
    # out/pooled/weights/state), capped at 48 MiB to stay safe on v7x's 64 MiB VMEM.
    vmem_needed = 4 * (2 * t_blk * L * G4
                       + b_pad * (OUT_LANES + H)
                       + 2 * (H * G4 + H * OUT_LANES + OUT_LANES)
                       + 2 * L * H)
    vmem_limit = int(min(48 * 1024 * 1024, max(32 * 1024 * 1024, 2 * vmem_needed)))

    out_padded = pl.pallas_call(
        kernel,
        out_shape=jax.ShapeDtypeStruct((b_pad, OUT_LANES), jnp.float32),
        grid_spec=pltpu.PrefetchScalarGridSpec(
            num_scalar_prefetch=0,
            grid=(n_blk,),                                          # blocked recurrence axis
            in_specs=[
                pl.BlockSpec((t_blk, L, G4), lambda b: (b, 0, 0)),  # gates block (streamed)
                pl.BlockSpec((H, G4), lambda b: (0, 0)),            # W_hh (resident)
                pl.BlockSpec((H, OUT_LANES), lambda b: (0, 0)),     # dense W (resident)
                pl.BlockSpec((1, OUT_LANES), lambda b: (0, 0)),     # dense b (resident)
            ],
            out_specs=pl.BlockSpec((b_pad, OUT_LANES), lambda b: (0, 0)),  # resident output
            scratch_shapes=[
                pltpu.VMEM((L, H), jnp.float32),      # h state (across blocks)
                pltpu.VMEM((L, H), jnp.float32),      # c state (across blocks)
                pltpu.VMEM((b_pad, H), jnp.float32),  # pooled rows
            ],
        ),
        compiler_params=pltpu.CompilerParams(
            dimension_semantics=("arbitrary",),       # state carried across grid blocks
            vmem_limit_bytes=vmem_limit,
        ),
        cost_estimate=cost,
    )(gates_x, params["whh_t"], params["wd_pad"], params["bd_pad"])
    return out_padded[:B, :N_CLASSES]


def init_params(key, n_tokens, pad_ix, out_size):
    k = jax.random.split(key, 7)
    H = out_size
    emb = jax.random.normal(k[0], (n_tokens, EMB_DIM), jnp.float32)
    emb = emb.at[pad_ix].set(0.0)          # nn.Embedding zeroes the padding_idx row
    s = 1.0 / np.sqrt(H)
    w_ih = jax.random.uniform(k[1], (4 * H, EMB_DIM), jnp.float32, -s, s)
    w_hh = jax.random.uniform(k[2], (4 * H, H), jnp.float32, -s, s)
    b_ih = jax.random.uniform(k[3], (4 * H,), jnp.float32, -s, s)
    b_hh = jax.random.uniform(k[4], (4 * H,), jnp.float32, -s, s)
    w_d = jax.random.uniform(k[5], (N_CLASSES, H), jnp.float32, -s, s)
    b_d = jax.random.uniform(k[6], (N_CLASSES,), jnp.float32, -s, s)

    # --- kernel-side preprocessing ------------------------------------------------
    # Per-token gate table: fuses the embedding gather with the input-to-hidden matmul
    # (and the combined LSTM bias), hoisting both out of the serial recurrence.
    emb_gates = (jnp.dot(emb, w_ih.T, precision=jax.lax.Precision.HIGHEST)
                 + (b_ih + b_hh)[None, :])                        # [n_tokens, 4H]
    # Lane-dense dense head: pad the 6-wide output to 128 lanes (zeros past col 6).
    wd_pad = jnp.zeros((H, OUT_LANES), jnp.float32).at[:, :N_CLASSES].set(w_d.T)
    bd_pad = jnp.zeros((1, OUT_LANES), jnp.float32).at[0, :N_CLASSES].set(b_d)

    return {
        # raw PyTorch-layout parameters (used by the pure-JAX reference)
        "emb": emb, "w_ih": w_ih, "w_hh": w_hh, "b_ih": b_ih, "b_hh": b_hh,
        "w_d": w_d, "b_d": b_d,
        # preprocessed kernel parameters
        "emb_gates": emb_gates,            # [n_tokens, 4H]
        "whh_t": w_hh.T,                   # [H, 4H]
        "wd_pad": wd_pad,                  # [H, 128]
        "bd_pad": bd_pad,                  # [1, 128]
    }


def reference_forward(text_ix, params):
    # Pure-JAX reference mirroring the PyTorch forward exactly (from raw weights).
    x = jnp.take(params["emb"], text_ix, axis=0)                  # [B, L, D]
    H = params["w_hh"].shape[1]
    wih_t = params["w_ih"].T
    whh_t = params["w_hh"].T
    b = (params["b_ih"] + params["b_hh"])[None, :]

    def step(carry, x_t):
        h, c = carry
        gates = (jnp.dot(x_t, wih_t, precision=jax.lax.Precision.HIGHEST)
                 + jnp.dot(h, whh_t, precision=jax.lax.Precision.HIGHEST) + b)
        i = jax.nn.sigmoid(gates[:, :H])
        f = jax.nn.sigmoid(gates[:, H:2 * H])
        g = jnp.tanh(gates[:, 2 * H:3 * H])
        o = jax.nn.sigmoid(gates[:, 3 * H:4 * H])
        c = f * c + i * g
        h = o * jnp.tanh(c)
        return (h, c), h

    L = x.shape[1]
    init = (jnp.zeros((L, H), jnp.float32), jnp.zeros((L, H), jnp.float32))
    _, outs = jax.lax.scan(step, init, x)                         # [B, L, H] (seq = B)
    pooled = jnp.max(outs, axis=1)                                # max over L
    act = jnp.maximum(pooled, 0.0)
    return jnp.dot(act, params["w_d"].T) + params["b_d"][None, :]  # [B, 6]


if __name__ == "__main__":
    key = jax.random.PRNGKey(0)
    n_tokens, pad_ix, out_size = 100, 0, 32
    B, L = 2, 8

    pkey, dkey = jax.random.split(key)
    params = init_params(pkey, n_tokens, pad_ix, out_size)
    # int64 indices in PyTorch; JAX uses int32 indices by default.
    text_ix = jax.random.randint(dkey, (B, L), 0, n_tokens, dtype=jnp.int32)

    out = comments_lstm_encoder(text_ix, params)
    out = jax.block_until_ready(out)

    ref = reference_forward(text_ix, params)
    # Tolerance covers Mosaic's default f32 matmul pass count vs the reference's
    # Precision.HIGHEST XLA matmuls; f32 path typically matches to ~1e-6.
    np.testing.assert_allclose(np.asarray(out), np.asarray(ref), rtol=1e-4, atol=1e-5)
    assert out.shape == (B, N_CLASSES)
    print("KERNEL_OK")
</pallas_src>

<mosaic_0001>
module attributes {stable_mosaic.version = 11 : i64} {
  func.func @_lstm_encoder_kernel(%arg0: i32, %arg1: memref<8x8x128xf32, #tpu.memory_space<vmem>>, %arg2: memref<32x128xf32, #tpu.memory_space<vmem>>, %arg3: memref<32x128xf32, #tpu.memory_space<vmem>>, %arg4: memref<1x128xf32, #tpu.memory_space<vmem>>, %arg5: memref<8x128xf32, #tpu.memory_space<vmem>>, %arg6: memref<8x32xf32, #tpu.memory_space<vmem>>, %arg7: memref<8x32xf32, #tpu.memory_space<vmem>>, %arg8: memref<8x32xf32, #tpu.memory_space<vmem>>) attributes {dimension_semantics = [#tpu.dimension_semantics<arbitrary>], iteration_bounds = array<i64: 1>, scalar_prefetch = 0 : i64, scratch_operands = 3 : i64, tpu.core_type = #tpu.core_type<tc>, window_params = [{transform_indices = @transform_0, window_bounds = array<i64: 8, 8, 128>}, {pipeline_mode = #tpu.pipeline_mode<synchronous>, transform_indices = @transform_1, window_bounds = array<i64: 32, 128>}, {pipeline_mode = #tpu.pipeline_mode<synchronous>, transform_indices = @transform_2, window_bounds = array<i64: 32, 128>}, {pipeline_mode = #tpu.pipeline_mode<synchronous>, transform_indices = @transform_3, window_bounds = array<i64: 1, 128>}, {pipeline_mode = #tpu.pipeline_mode<synchronous>, transform_indices = @transform_4, window_bounds = array<i64: 8, 128>}]} {
    %c0_i32 = arith.constant 0 : i32
    %0 = arith.cmpi eq, %arg0, %c0_i32 : i32
    %1 = arith.extui %0 : i1 to i32
    %c0_i32_0 = arith.constant 0 : i32
    %2 = arith.cmpi ne, %1, %c0_i32_0 : i32
    scf.if %2 {
      %cst_71 = arith.constant 0.000000e+00 : f32
      %313 = vector.broadcast %cst_71 : f32 to vector<8x32xf32>
      %c0_72 = arith.constant 0 : index
      %c0_73 = arith.constant 0 : index
      %314 = vector.load %arg6[%c0_72, %c0_73] : memref<8x32xf32, #tpu.memory_space<vmem>>, vector<8x32xf32>
      tpu.vector_store %arg6[%c0_72, %c0_73], %313 {strides = array<i32>} : memref<8x32xf32, #tpu.memory_space<vmem>>, vector<8x32xf32>,
      %cst_74 = arith.constant 0.000000e+00 : f32
      %315 = vector.broadcast %cst_74 : f32 to vector<8x32xf32>
      %c0_75 = arith.constant 0 : index
      %c0_76 = arith.constant 0 : index
      %316 = vector.load %arg7[%c0_75, %c0_76] : memref<8x32xf32, #tpu.memory_space<vmem>>, vector<8x32xf32>
      tpu.vector_store %arg7[%c0_75, %c0_76], %315 {strides = array<i32>} : memref<8x32xf32, #tpu.memory_space<vmem>>, vector<8x32xf32>,
    } else {
    }
    %c0 = arith.constant 0 : index
    %c0_1 = arith.constant 0 : index
    %3 = vector.load %arg2[%c0, %c0_1] : memref<32x128xf32, #tpu.memory_space<vmem>>, vector<32x128xf32>
    %c0_2 = arith.constant 0 : index
    %c0_3 = arith.constant 0 : index
    %4 = vector.load %arg6[%c0_2, %c0_3] : memref<8x32xf32, #tpu.memory_space<vmem>>, vector<8x32xf32>
    %c0_4 = arith.constant 0 : index
    %c0_5 = arith.constant 0 : index
    %5 = vector.load %arg7[%c0_4, %c0_5] : memref<8x32xf32, #tpu.memory_space<vmem>>, vector<8x32xf32>
    %cst = arith.constant 0.000000e+00 : f32
    %6 = vector.broadcast %cst : f32 to vector<8x32xf32>
    %7 = tpu.iota {dimensions = array<i32: 0>} : vector<8x32xi32>
    %c0_i32_6 = arith.constant 0 : i32
    %8 = arith.index_cast %c0_i32_6 : i32 to index
    %c0_7 = arith.constant 0 : index
    %c0_8 = arith.constant 0 : index
    %9 = vector.load %arg1[%8, %c0_7, %c0_8] : memref<8x8x128xf32, #tpu.memory_space<vmem>>, vector<1x8x128xf32>
    %10 = vector.shape_cast %9 : vector<1x8x128xf32> to vector<8x128xf32>
    %cst_9 = arith.constant dense<0.000000e+00> : vector<8x128xf32>
    %11 = tpu.matmul %4, %3, %cst_9 {dimension_numbers = #tpu.dot_dimension_numbers<[1], [0], [0], [1], [0, 0, 1, 1], [], []>} : vector<8x32xf32>, vector<32x128xf32>, vector<8x128xf32> -> vector<8x128xf32>
    %12 = arith.addf %10, %11 : vector<8x128xf32>
    %13 = vector.extract_strided_slice %12 {offsets = [0, 0], sizes = [8, 32], strides = [1, 1]} : vector<8x128xf32> to vector<8x32xf32>
    %14 = arith.negf %13 : vector<8x32xf32>
    %15 = math.exp %14 : vector<8x32xf32>
    %cst_10 = arith.constant 1.000000e+00 : f32
    %16 = vector.broadcast %cst_10 : f32 to vector<8x32xf32>
    %17 = arith.addf %16, %15 : vector<8x32xf32>
    %18 = arith.divf %16, %17 : vector<8x32xf32>
    %19 = vector.extract_strided_slice %12 {offsets = [0, 32], sizes = [8, 32], strides = [1, 1]} : vector<8x128xf32> to vector<8x32xf32>
    %20 = arith.negf %19 : vector<8x32xf32>
    %21 = math.exp %20 : vector<8x32xf32>
    %cst_11 = arith.constant 1.000000e+00 : f32
    %22 = vector.broadcast %cst_11 : f32 to vector<8x32xf32>
    %23 = arith.addf %22, %21 : vector<8x32xf32>
    %24 = arith.divf %22, %23 : vector<8x32xf32>
    %25 = vector.extract_strided_slice %12 {offsets = [0, 64], sizes = [8, 32], strides = [1, 1]} : vector<8x128xf32> to vector<8x32xf32>
    %26 = math.tanh %25 : vector<8x32xf32>
    %27 = vector.extract_strided_slice %12 {offsets = [0, 96], sizes = [8, 32], strides = [1, 1]} : vector<8x128xf32> to vector<8x32xf32>
    %28 = arith.negf %27 : vector<8x32xf32>
    %29 = math.exp %28 : vector<8x32xf32>
    %cst_12 = arith.constant 1.000000e+00 : f32
    %30 = vector.broadcast %cst_12 : f32 to vector<8x32xf32>
    %31 = arith.addf %30, %29 : vector<8x32xf32>
    %32 = arith.divf %30, %31 : vector<8x32xf32>
    %33 = arith.mulf %24, %5 : vector<8x32xf32>
    %34 = arith.mulf %18, %26 : vector<8x32xf32>
    %35 = arith.addf %33, %34 : vector<8x32xf32>
    %36 = math.tanh %35 : vector<8x32xf32>
    %37 = arith.mulf %32, %36 : vector<8x32xf32>
    %cst_13 = arith.constant dense<0xFF800000> : vector<32xf32>
    %38 = vector.multi_reduction <maximumf>, %37, %cst_13 [0] : vector<8x32xf32> to vector<32xf32>
    %39 = vector.shape_cast %38 : vector<32xf32> to vector<1x32xf32>
    %40 = vector.broadcast %c0_i32_6 : i32 to vector<8x32xi32>
    %41 = arith.cmpi eq, %7, %40 : vector<8x32xi32>
    %42 = vector.shape_cast %39 : vector<1x32xf32> to vector<1x32xf32>
    %43 = vector.broadcast %42 : vector<1x32xf32> to vector<8x32xf32>
    %44 = arith.select %41, %43, %6 : vector<8x32xi1>, vector<8x32xf32>
    %c1_i32 = arith.constant 1 : i32
    %45 = arith.index_cast %c1_i32 : i32 to index
    %c0_14 = arith.constant 0 : index
    %c0_15 = arith.constant 0 : index
    %46 = vector.load %arg1[%45, %c0_14, %c0_15] : memref<8x8x128xf32, #tpu.memory_space<vmem>>, vector<1x8x128xf32>
    %47 = vector.shape_cast %46 : vector<1x8x128xf32> to vector<8x128xf32>
    %cst_16 = arith.constant dense<0.000000e+00> : vector<8x128xf32>
    %48 = tpu.matmul %37, %3, %cst_16 {dimension_numbers = #tpu.dot_dimension_numbers<[1], [0], [0], [1], [0, 0, 1, 1], [], []>} : vector<8x32xf32>, vector<32x128xf32>, vector<8x128xf32> -> vector<8x128xf32>
    %49 = arith.addf %47, %48 : vector<8x128xf32>
    %50 = vector.extract_strided_slice %49 {offsets = [0, 0], sizes = [8, 32], strides = [1, 1]} : vector<8x128xf32> to vector<8x32xf32>
    %51 = arith.negf %50 : vector<8x32xf32>
    %52 = math.exp %51 : vector<8x32xf32>
    %cst_17 = arith.constant 1.000000e+00 : f32
    %53 = vector.broadcast %cst_17 : f32 to vector<8x32xf32>
    %54 = arith.addf %53, %52 : vector<8x32xf32>
    %55 = arith.divf %53, %54 : vector<8x32xf32>
    %56 = vector.extract_strided_slice %49 {offsets = [0, 32], sizes = [8, 32], strides = [1, 1]} : vector<8x128xf32> to vector<8x32xf32>
    %57 = arith.negf %56 : vector<8x32xf32>
    %58 = math.exp %57 : vector<8x32xf32>
    %cst_18 = arith.constant 1.000000e+00 : f32
    %59 = vector.broadcast %cst_18 : f32 to vector<8x32xf32>
    %60 = arith.addf %59, %58 : vector<8x32xf32>
    %61 = arith.divf %59, %60 : vector<8x32xf32>
    %62 = vector.extract_strided_slice %49 {offsets = [0, 64], sizes = [8, 32], strides = [1, 1]} : vector<8x128xf32> to vector<8x32xf32>
    %63 = math.tanh %62 : vector<8x32xf32>
    %64 = vector.extract_strided_slice %49 {offsets = [0, 96], sizes = [8, 32], strides = [1, 1]} : vector<8x128xf32> to vector<8x32xf32>
    %65 = arith.negf %64 : vector<8x32xf32>
    %66 = math.exp %65 : vector<8x32xf32>
    %cst_19 = arith.constant 1.000000e+00 : f32
    %67 = vector.broadcast %cst_19 : f32 to vector<8x32xf32>
    %68 = arith.addf %67, %66 : vector<8x32xf32>
    %69 = arith.divf %67, %68 : vector<8x32xf32>
    %70 = arith.mulf %61, %35 : vector<8x32xf32>
    %71 = arith.mulf %55, %63 : vector<8x32xf32>
    %72 = arith.addf %70, %71 : vector<8x32xf32>
    %73 = math.tanh %72 : vector<8x32xf32>
    %74 = arith.mulf %69, %73 : vector<8x32xf32>
    %cst_20 = arith.constant dense<0xFF800000> : vector<32xf32>
    %75 = vector.multi_reduction <maximumf>, %74, %cst_20 [0] : vector<8x32xf32> to vector<32xf32>
    %76 = vector.shape_cast %75 : vector<32xf32> to vector<1x32xf32>
    %77 = vector.broadcast %c1_i32 : i32 to vector<8x32xi32>
    %78 = arith.cmpi eq, %7, %77 : vector<8x32xi32>
    %79 = vector.shape_cast %76 : vector<1x32xf32> to vector<1x32xf32>
    %80 = vector.broadcast %79 : vector<1x32xf32> to vector<8x32xf32>
    %81 = arith.select %78, %80, %44 : vector<8x32xi1>, vector<8x32xf32>
    %c2_i32 = arith.constant 2 : i32
    %82 = arith.index_cast %c2_i32 : i32 to index
    %c0_21 = arith.constant 0 : index
    %c0_22 = arith.constant 0 : index
    %83 = vector.load %arg1[%82, %c0_21, %c0_22] : memref<8x8x128xf32, #tpu.memory_space<vmem>>, vector<1x8x128xf32>
    %84 = vector.shape_cast %83 : vector<1x8x128xf32> to vector<8x128xf32>
    %cst_23 = arith.constant dense<0.000000e+00> : vector<8x128xf32>
    %85 = tpu.matmul %74, %3, %cst_23 {dimension_numbers = #tpu.dot_dimension_numbers<[1], [0], [0], [1], [0, 0, 1, 1], [], []>} : vector<8x32xf32>, vector<32x128xf32>, vector<8x128xf32> -> vector<8x128xf32>
    %86 = arith.addf %84, %85 : vector<8x128xf32>
    %87 = vector.extract_strided_slice %86 {offsets = [0, 0], sizes = [8, 32], strides = [1, 1]} : vector<8x128xf32> to vector<8x32xf32>
    %88 = arith.negf %87 : vector<8x32xf32>
    %89 = math.exp %88 : vector<8x32xf32>
    %cst_24 = arith.constant 1.000000e+00 : f32
    %90 = vector.broadcast %cst_24 : f32 to vector<8x32xf32>
    %91 = arith.addf %90, %89 : vector<8x32xf32>
    %92 = arith.divf %90, %91 : vector<8x32xf32>
    %93 = vector.extract_strided_slice %86 {offsets = [0, 32], sizes = [8, 32], strides = [1, 1]} : vector<8x128xf32> to vector<8x32xf32>
    %94 = arith.negf %93 : vector<8x32xf32>
    %95 = math.exp %94 : vector<8x32xf32>
    %cst_25 = arith.constant 1.000000e+00 : f32
    %96 = vector.broadcast %cst_25 : f32 to vector<8x32xf32>
    %97 = arith.addf %96, %95 : vector<8x32xf32>
    %98 = arith.divf %96, %97 : vector<8x32xf32>
    %99 = vector.extract_strided_slice %86 {offsets = [0, 64], sizes = [8, 32], strides = [1, 1]} : vector<8x128xf32> to vector<8x32xf32>
    %100 = math.tanh %99 : vector<8x32xf32>
    %101 = vector.extract_strided_slice %86 {offsets = [0, 96], sizes = [8, 32], strides = [1, 1]} : vector<8x128xf32> to vector<8x32xf32>
    %102 = arith.negf %101 : vector<8x32xf32>
    %103 = math.exp %102 : vector<8x32xf32>
    %cst_26 = arith.constant 1.000000e+00 : f32
    %104 = vector.broadcast %cst_26 : f32 to vector<8x32xf32>
    %105 = arith.addf %104, %103 : vector<8x32xf32>
    %106 = arith.divf %104, %105 : vector<8x32xf32>
    %107 = arith.mulf %98, %72 : vector<8x32xf32>
    %108 = arith.mulf %92, %100 : vector<8x32xf32>
    %109 = arith.addf %107, %108 : vector<8x32xf32>
    %110 = math.tanh %109 : vector<8x32xf32>
    %111 = arith.mulf %106, %110 : vector<8x32xf32>
    %cst_27 = arith.constant dense<0xFF800000> : vector<32xf32>
    %112 = vector.multi_reduction <maximumf>, %111, %cst_27 [0] : vector<8x32xf32> to vector<32xf32>
    %113 = vector.shape_cast %112 : vector<32xf32> to vector<1x32xf32>
    %114 = vector.broadcast %c2_i32 : i32 to vector<8x32xi32>
    %115 = arith.cmpi eq, %7, %114 : vector<8x32xi32>
    %116 = vector.shape_cast %113 : vector<1x32xf32> to vector<1x32xf32>
    %117 = vector.broadcast %116 : vector<1x32xf32> to vector<8x32xf32>
    %118 = arith.select %115, %117, %81 : vector<8x32xi1>, vector<8x32xf32>
    %c3_i32 = arith.constant 3 : i32
    %119 = arith.index_cast %c3_i32 : i32 to index
    %c0_28 = arith.constant 0 : index
    %c0_29 = arith.constant 0 : index
    %120 = vector.load %arg1[%119, %c0_28, %c0_29] : memref<8x8x128xf32, #tpu.memory_space<vmem>>, vector<1x8x128xf32>
    %121 = vector.shape_cast %120 : vector<1x8x128xf32> to vector<8x128xf32>
    %cst_30 = arith.constant dense<0.000000e+00> : vector<8x128xf32>
    %122 = tpu.matmul %111, %3, %cst_30 {dimension_numbers = #tpu.dot_dimension_numbers<[1], [0], [0], [1], [0, 0, 1, 1], [], []>} : vector<8x32xf32>, vector<32x128xf32>, vector<8x128xf32> -> vector<8x128xf32>
    %123 = arith.addf %121, %122 : vector<8x128xf32>
    %124 = vector.extract_strided_slice %123 {offsets = [0, 0], sizes = [8, 32], strides = [1, 1]} : vector<8x128xf32> to vector<8x32xf32>
    %125 = arith.negf %124 : vector<8x32xf32>
    %126 = math.exp %125 : vector<8x32xf32>
    %cst_31 = arith.constant 1.000000e+00 : f32
    %127 = vector.broadcast %cst_31 : f32 to vector<8x32xf32>
    %128 = arith.addf %127, %126 : vector<8x32xf32>
    %129 = arith.divf %127, %128 : vector<8x32xf32>
    %130 = vector.extract_strided_slice %123 {offsets = [0, 32], sizes = [8, 32], strides = [1, 1]} : vector<8x128xf32> to vector<8x32xf32>
    %131 = arith.negf %130 : vector<8x32xf32>
    %132 = math.exp %131 : vector<8x32xf32>
    %cst_32 = arith.constant 1.000000e+00 : f32
    %133 = vector.broadcast %cst_32 : f32 to vector<8x32xf32>
    %134 = arith.addf %133, %132 : vector<8x32xf32>
    %135 = arith.divf %133, %134 : vector<8x32xf32>
    %136 = vector.extract_strided_slice %123 {offsets = [0, 64], sizes = [8, 32], strides = [1, 1]} : vector<8x128xf32> to vector<8x32xf32>
    %137 = math.tanh %136 : vector<8x32xf32>
    %138 = vector.extract_strided_slice %123 {offsets = [0, 96], sizes = [8, 32], strides = [1, 1]} : vector<8x128xf32> to vector<8x32xf32>
    %139 = arith.negf %138 : vector<8x32xf32>
    %140 = math.exp %139 : vector<8x32xf32>
    %cst_33 = arith.constant 1.000000e+00 : f32
    %141 = vector.broadcast %cst_33 : f32 to vector<8x32xf32>
    %142 = arith.addf %141, %140 : vector<8x32xf32>
    %143 = arith.divf %141, %142 : vector<8x32xf32>
    %144 = arith.mulf %135, %109 : vector<8x32xf32>
    %145 = arith.mulf %129, %137 : vector<8x32xf32>
    %146 = arith.addf %144, %145 : vector<8x32xf32>
    %147 = math.tanh %146 : vector<8x32xf32>
    %148 = arith.mulf %143, %147 : vector<8x32xf32>
    %cst_34 = arith.constant dense<0xFF800000> : vector<32xf32>
    %149 = vector.multi_reduction <maximumf>, %148, %cst_34 [0] : vector<8x32xf32> to vector<32xf32>
    %150 = vector.shape_cast %149 : vector<32xf32> to vector<1x32xf32>
    %151 = vector.broadcast %c3_i32 : i32 to vector<8x32xi32>
    %152 = arith.cmpi eq, %7, %151 : vector<8x32xi32>
    %153 = vector.shape_cast %150 : vector<1x32xf32> to vector<1x32xf32>
    %154 = vector.broadcast %153 : vector<1x32xf32> to vector<8x32xf32>
    %155 = arith.select %152, %154, %118 : vector<8x32xi1>, vector<8x32xf32>
    %c4_i32 = arith.constant 4 : i32
    %156 = arith.index_cast %c4_i32 : i32 to index
    %c0_35 = arith.constant 0 : index
    %c0_36 = arith.constant 0 : index
    %157 = vector.load %arg1[%156, %c0_35, %c0_36] : memref<8x8x128xf32, #tpu.memory_space<vmem>>, vector<1x8x128xf32>
    %158 = vector.shape_cast %157 : vector<1x8x128xf32> to vector<8x128xf32>
    %cst_37 = arith.constant dense<0.000000e+00> : vector<8x128xf32>
    %159 = tpu.matmul %148, %3, %cst_37 {dimension_numbers = #tpu.dot_dimension_numbers<[1], [0], [0], [1], [0, 0, 1, 1], [], []>} : vector<8x32xf32>, vector<32x128xf32>, vector<8x128xf32> -> vector<8x128xf32>
    %160 = arith.addf %158, %159 : vector<8x128xf32>
    %161 = vector.extract_strided_slice %160 {offsets = [0, 0], sizes = [8, 32], strides = [1, 1]} : vector<8x128xf32> to vector<8x32xf32>
    %162 = arith.negf %161 : vector<8x32xf32>
    %163 = math.exp %162 : vector<8x32xf32>
    %cst_38 = arith.constant 1.000000e+00 : f32
    %164 = vector.broadcast %cst_38 : f32 to vector<8x32xf32>
    %165 = arith.addf %164, %163 : vector<8x32xf32>
    %166 = arith.divf %164, %165 : vector<8x32xf32>
    %167 = vector.extract_strided_slice %160 {offsets = [0, 32], sizes = [8, 32], strides = [1, 1]} : vector<8x128xf32> to vector<8x32xf32>
    %168 = arith.negf %167 : vector<8x32xf32>
    %169 = math.exp %168 : vector<8x32xf32>
    %cst_39 = arith.constant 1.000000e+00 : f32
    %170 = vector.broadcast %cst_39 : f32 to vector<8x32xf32>
    %171 = arith.addf %170, %169 : vector<8x32xf32>
    %172 = arith.divf %170, %171 : vector<8x32xf32>
    %173 = vector.extract_strided_slice %160 {offsets = [0, 64], sizes = [8, 32], strides = [1, 1]} : vector<8x128xf32> to vector<8x32xf32>
    %174 = math.tanh %173 : vector<8x32xf32>
    %175 = vector.extract_strided_slice %160 {offsets = [0, 96], sizes = [8, 32], strides = [1, 1]} : vector<8x128xf32> to vector<8x32xf32>
    %176 = arith.negf %175 : vector<8x32xf32>
    %177 = math.exp %176 : vector<8x32xf32>
    %cst_40 = arith.constant 1.000000e+00 : f32
    %178 = vector.broadcast %cst_40 : f32 to vector<8x32xf32>
    %179 = arith.addf %178, %177 : vector<8x32xf32>
    %180 = arith.divf %178, %179 : vector<8x32xf32>
    %181 = arith.mulf %172, %146 : vector<8x32xf32>
    %182 = arith.mulf %166, %174 : vector<8x32xf32>
    %183 = arith.addf %181, %182 : vector<8x32xf32>
    %184 = math.tanh %183 : vector<8x32xf32>
    %185 = arith.mulf %180, %184 : vector<8x32xf32>
    %cst_41 = arith.constant dense<0xFF800000> : vector<32xf32>
    %186 = vector.multi_reduction <maximumf>, %185, %cst_41 [0] : vector<8x32xf32> to vector<32xf32>
    %187 = vector.shape_cast %186 : vector<32xf32> to vector<1x32xf32>
    %188 = vector.broadcast %c4_i32 : i32 to vector<8x32xi32>
    %189 = arith.cmpi eq, %7, %188 : vector<8x32xi32>
    %190 = vector.shape_cast %187 : vector<1x32xf32> to vector<1x32xf32>
    %191 = vector.broadcast %190 : vector<1x32xf32> to vector<8x32xf32>
    %192 = arith.select %189, %191, %155 : vector<8x32xi1>, vector<8x32xf32>
    %c5_i32 = arith.constant 5 : i32
    %193 = arith.index_cast %c5_i32 : i32 to index
    %c0_42 = arith.constant 0 : index
    %c0_43 = arith.constant 0 : index
    %194 = vector.load %arg1[%193, %c0_42, %c0_43] : memref<8x8x128xf32, #tpu.memory_space<vmem>>, vector<1x8x128xf32>
    %195 = vector.shape_cast %194 : vector<1x8x128xf32> to vector<8x128xf32>
    %cst_44 = arith.constant dense<0.000000e+00> : vector<8x128xf32>
    %196 = tpu.matmul %185, %3, %cst_44 {dimension_numbers = #tpu.dot_dimension_numbers<[1], [0], [0], [1], [0, 0, 1, 1], [], []>} : vector<8x32xf32>, vector<32x128xf32>, vector<8x128xf32> -> vector<8x128xf32>
    %197 = arith.addf %195, %196 : vector<8x128xf32>
    %198 = vector.extract_strided_slice %197 {offsets = [0, 0], sizes = [8, 32], strides = [1, 1]} : vector<8x128xf32> to vector<8x32xf32>
    %199 = arith.negf %198 : vector<8x32xf32>
    %200 = math.exp %199 : vector<8x32xf32>
    %cst_45 = arith.constant 1.000000e+00 : f32
    %201 = vector.broadcast %cst_45 : f32 to vector<8x32xf32>
    %202 = arith.addf %201, %200 : vector<8x32xf32>
    %203 = arith.divf %201, %202 : vector<8x32xf32>
    %204 = vector.extract_strided_slice %197 {offsets = [0, 32], sizes = [8, 32], strides = [1, 1]} : vector<8x128xf32> to vector<8x32xf32>
    %205 = arith.negf %204 : vector<8x32xf32>
    %206 = math.exp %205 : vector<8x32xf32>
    %cst_46 = arith.constant 1.000000e+00 : f32
    %207 = vector.broadcast %cst_46 : f32 to vector<8x32xf32>
    %208 = arith.addf %207, %206 : vector<8x32xf32>
    %209 = arith.divf %207, %208 : vector<8x32xf32>
    %210 = vector.extract_strided_slice %197 {offsets = [0, 64], sizes = [8, 32], strides = [1, 1]} : vector<8x128xf32> to vector<8x32xf32>
    %211 = math.tanh %210 : vector<8x32xf32>
    %212 = vector.extract_strided_slice %197 {offsets = [0, 96], sizes = [8, 32], strides = [1, 1]} : vector<8x128xf32> to vector<8x32xf32>
    %213 = arith.negf %212 : vector<8x32xf32>
    %214 = math.exp %213 : vector<8x32xf32>
    %cst_47 = arith.constant 1.000000e+00 : f32
    %215 = vector.broadcast %cst_47 : f32 to vector<8x32xf32>
    %216 = arith.addf %215, %214 : vector<8x32xf32>
    %217 = arith.divf %215, %216 : vector<8x32xf32>
    %218 = arith.mulf %209, %183 : vector<8x32xf32>
    %219 = arith.mulf %203, %211 : vector<8x32xf32>
    %220 = arith.addf %218, %219 : vector<8x32xf32>
    %221 = math.tanh %220 : vector<8x32xf32>
    %222 = arith.mulf %217, %221 : vector<8x32xf32>
    %cst_48 = arith.constant dense<0xFF800000> : vector<32xf32>
    %223 = vector.multi_reduction <maximumf>, %222, %cst_48 [0] : vector<8x32xf32> to vector<32xf32>
    %224 = vector.shape_cast %223 : vector<32xf32> to vector<1x32xf32>
    %225 = vector.broadcast %c5_i32 : i32 to vector<8x32xi32>
    %226 = arith.cmpi eq, %7, %225 : vector<8x32xi32>
    %227 = vector.shape_cast %224 : vector<1x32xf32> to vector<1x32xf32>
    %228 = vector.broadcast %227 : vector<1x32xf32> to vector<8x32xf32>
    %229 = arith.select %226, %228, %192 : vector<8x32xi1>, vector<8x32xf32>
    %c6_i32 = arith.constant 6 : i32
    %230 = arith.index_cast %c6_i32 : i32 to index
    %c0_49 = arith.constant 0 : index
    %c0_50 = arith.constant 0 : index
    %231 = vector.load %arg1[%230, %c0_49, %c0_50] : memref<8x8x128xf32, #tpu.memory_space<vmem>>, vector<1x8x128xf32>
    %232 = vector.shape_cast %231 : vector<1x8x128xf32> to vector<8x128xf32>
    %cst_51 = arith.constant dense<0.000000e+00> : vector<8x128xf32>
    %233 = tpu.matmul %222, %3, %cst_51 {dimension_numbers = #tpu.dot_dimension_numbers<[1], [0], [0], [1], [0, 0, 1, 1], [], []>} : vector<8x32xf32>, vector<32x128xf32>, vector<8x128xf32> -> vector<8x128xf32>
    %234 = arith.addf %232, %233 : vector<8x128xf32>
    %235 = vector.extract_strided_slice %234 {offsets = [0, 0], sizes = [8, 32], strides = [1, 1]} : vector<8x128xf32> to vector<8x32xf32>
    %236 = arith.negf %235 : vector<8x32xf32>
    %237 = math.exp %236 : vector<8x32xf32>
    %cst_52 = arith.constant 1.000000e+00 : f32
    %238 = vector.broadcast %cst_52 : f32 to vector<8x32xf32>
    %239 = arith.addf %238, %237 : vector<8x32xf32>
    %240 = arith.divf %238, %239 : vector<8x32xf32>
    %241 = vector.extract_strided_slice %234 {offsets = [0, 32], sizes = [8, 32], strides = [1, 1]} : vector<8x128xf32> to vector<8x32xf32>
    %242 = arith.negf %241 : vector<8x32xf32>
    %243 = math.exp %242 : vector<8x32xf32>
    %cst_53 = arith.constant 1.000000e+00 : f32
    %244 = vector.broadcast %cst_53 : f32 to vector<8x32xf32>
    %245 = arith.addf %244, %243 : vector<8x32xf32>
    %246 = arith.divf %244, %245 : vector<8x32xf32>
    %247 = vector.extract_strided_slice %234 {offsets = [0, 64], sizes = [8, 32], strides = [1, 1]} : vector<8x128xf32> to vector<8x32xf32>
    %248 = math.tanh %247 : vector<8x32xf32>
    %249 = vector.extract_strided_slice %234 {offsets = [0, 96], sizes = [8, 32], strides = [1, 1]} : vector<8x128xf32> to vector<8x32xf32>
    %250 = arith.negf %249 : vector<8x32xf32>
    %251 = math.exp %250 : vector<8x32xf32>
    %cst_54 = arith.constant 1.000000e+00 : f32
    %252 = vector.broadcast %cst_54 : f32 to vector<8x32xf32>
    %253 = arith.addf %252, %251 : vector<8x32xf32>
    %254 = arith.divf %252, %253 : vector<8x32xf32>
    %255 = arith.mulf %246, %220 : vector<8x32xf32>
    %256 = arith.mulf %240, %248 : vector<8x32xf32>
    %257 = arith.addf %255, %256 : vector<8x32xf32>
    %258 = math.tanh %257 : vector<8x32xf32>
    %259 = arith.mulf %254, %258 : vector<8x32xf32>
    %cst_55 = arith.constant dense<0xFF800000> : vector<32xf32>
    %260 = vector.multi_reduction <maximumf>, %259, %cst_55 [0] : vector<8x32xf32> to vector<32xf32>
    %261 = vector.shape_cast %260 : vector<32xf32> to vector<1x32xf32>
    %262 = vector.broadcast %c6_i32 : i32 to vector<8x32xi32>
    %263 = arith.cmpi eq, %7, %262 : vector<8x32xi32>
    %264 = vector.shape_cast %261 : vector<1x32xf32> to vector<1x32xf32>
    %265 = vector.broadcast %264 : vector<1x32xf32> to vector<8x32xf32>
    %266 = arith.select %263, %265, %229 : vector<8x32xi1>, vector<8x32xf32>
    %c7_i32 = arith.constant 7 : i32
    %267 = arith.index_cast %c7_i32 : i32 to index
    %c0_56 = arith.constant 0 : index
    %c0_57 = arith.constant 0 : index
    %268 = vector.load %arg1[%267, %c0_56, %c0_57] : memref<8x8x128xf32, #tpu.memory_space<vmem>>, vector<1x8x128xf32>
    %269 = vector.shape_cast %268 : vector<1x8x128xf32> to vector<8x128xf32>
    %cst_58 = arith.constant dense<0.000000e+00> : vector<8x128xf32>
    %270 = tpu.matmul %259, %3, %cst_58 {dimension_numbers = #tpu.dot_dimension_numbers<[1], [0], [0], [1], [0, 0, 1, 1], [], []>} : vector<8x32xf32>, vector<32x128xf32>, vector<8x128xf32> -> vector<8x128xf32>
    %271 = arith.addf %269, %270 : vector<8x128xf32>
    %272 = vector.extract_strided_slice %271 {offsets = [0, 0], sizes = [8, 32], strides = [1, 1]} : vector<8x128xf32> to vector<8x32xf32>
    %273 = arith.negf %272 : vector<8x32xf32>
    %274 = math.exp %273 : vector<8x32xf32>
    %cst_59 = arith.constant 1.000000e+00 : f32
    %275 = vector.broadcast %cst_59 : f32 to vector<8x32xf32>
    %276 = arith.addf %275, %274 : vector<8x32xf32>
    %277 = arith.divf %275, %276 : vector<8x32xf32>
    %278 = vector.extract_strided_slice %271 {offsets = [0, 32], sizes = [8, 32], strides = [1, 1]} : vector<8x128xf32> to vector<8x32xf32>
    %279 = arith.negf %278 : vector<8x32xf32>
    %280 = math.exp %279 : vector<8x32xf32>
    %cst_60 = arith.constant 1.000000e+00 : f32
    %281 = vector.broadcast %cst_60 : f32 to vector<8x32xf32>
    %282 = arith.addf %281, %280 : vector<8x32xf32>
    %283 = arith.divf %281, %282 : vector<8x32xf32>
    %284 = vector.extract_strided_slice %271 {offsets = [0, 64], sizes = [8, 32], strides = [1, 1]} : vector<8x128xf32> to vector<8x32xf32>
    %285 = math.tanh %284 : vector<8x32xf32>
    %286 = vector.extract_strided_slice %271 {offsets = [0, 96], sizes = [8, 32], strides = [1, 1]} : vector<8x128xf32> to vector<8x32xf32>
    %287 = arith.negf %286 : vector<8x32xf32>
    %288 = math.exp %287 : vector<8x32xf32>
    %cst_61 = arith.constant 1.000000e+00 : f32
    %289 = vector.broadcast %cst_61 : f32 to vector<8x32xf32>
    %290 = arith.addf %289, %288 : vector<8x32xf32>
    %291 = arith.divf %289, %290 : vector<8x32xf32>
    %292 = arith.mulf %283, %257 : vector<8x32xf32>
    %293 = arith.mulf %277, %285 : vector<8x32xf32>
    %294 = arith.addf %292, %293 : vector<8x32xf32>
    %295 = math.tanh %294 : vector<8x32xf32>
    %296 = arith.mulf %291, %295 : vector<8x32xf32>
    %cst_62 = arith.constant dense<0xFF800000> : vector<32xf32>
    %297 = vector.multi_reduction <maximumf>, %296, %cst_62 [0] : vector<8x32xf32> to vector<32xf32>
    %298 = vector.shape_cast %297 : vector<32xf32> to vector<1x32xf32>
    %299 = vector.broadcast %c7_i32 : i32 to vector<8x32xi32>
    %300 = arith.cmpi eq, %7, %299 : vector<8x32xi32>
    %301 = vector.shape_cast %298 : vector<1x32xf32> to vector<1x32xf32>
    %302 = vector.broadcast %301 : vector<1x32xf32> to vector<8x32xf32>
    %303 = arith.select %300, %302, %266 : vector<8x32xi1>, vector<8x32xf32>
    %c8_i32 = arith.constant 8 : i32
    %c0_63 = arith.constant 0 : index
    %c0_64 = arith.constant 0 : index
    %304 = vector.load %arg6[%c0_63, %c0_64] : memref<8x32xf32, #tpu.memory_space<vmem>>, vector<8x32xf32>
    tpu.vector_store %arg6[%c0_63, %c0_64], %296 {strides = array<i32>} : memref<8x32xf32, #tpu.memory_space<vmem>>, vector<8x32xf32>,
    %c0_65 = arith.constant 0 : index
    %c0_66 = arith.constant 0 : index
    %305 = vector.load %arg7[%c0_65, %c0_66] : memref<8x32xf32, #tpu.memory_space<vmem>>, vector<8x32xf32>
    tpu.vector_store %arg7[%c0_65, %c0_66], %294 {strides = array<i32>} : memref<8x32xf32, #tpu.memory_space<vmem>>, vector<8x32xf32>,
    %c8_i32_67 = arith.constant 8 : i32
    %306 = arith.muli %arg0, %c8_i32_67 : i32
    %307 = tpu.assume_multiple %306, 8 : i32
    %308 = arith.index_cast %307 : i32 to index
    %c0_68 = arith.constant 0 : index
    %309 = vector.load %arg8[%308, %c0_68] : memref<8x32xf32, #tpu.memory_space<vmem>>, vector<8x32xf32>
    tpu.vector_store %arg8[%308, %c0_68], %303 {strides = array<i32>} : memref<8x32xf32, #tpu.memory_space<vmem>>, vector<8x32xf32>,
    %c0_i32_69 = arith.constant 0 : i32
    %310 = arith.cmpi eq, %arg0, %c0_i32_69 : i32
    %311 = arith.extui %310 : i1 to i32
    %c0_i32_70 = arith.constant 0 : i32
    %312 = arith.cmpi ne, %311, %c0_i32_70 : i32
    scf.if %312 {
      %c0_71 = arith.constant 0 : index
      %c0_72 = arith.constant 0 : index
      %313 = vector.load %arg8[%c0_71, %c0_72] : memref<8x32xf32, #tpu.memory_space<vmem>>, vector<8x32xf32>
      %cst_73 = arith.constant 0.000000e+00 : f32
      %314 = vector.broadcast %cst_73 : f32 to vector<8x32xf32>
      %315 = arith.maximumf %313, %314 : vector<8x32xf32>
      %c0_74 = arith.constant 0 : index
      %c0_75 = arith.constant 0 : index
      %316 = vector.load %arg3[%c0_74, %c0_75] : memref<32x128xf32, #tpu.memory_space<vmem>>, vector<32x128xf32>
      %cst_76 = arith.constant dense<0.000000e+00> : vector<8x128xf32>
      %317 = tpu.matmul %315, %316, %cst_76 {dimension_numbers = #tpu.dot_dimension_numbers<[1], [0], [0], [1], [0, 0, 1, 1], [], []>} : vector<8x32xf32>, vector<32x128xf32>, vector<8x128xf32> -> vector<8x128xf32>
      %c0_77 = arith.constant 0 : index
      %c0_78 = arith.constant 0 : index
      %318 = vector.load %arg4[%c0_77, %c0_78] : memref<1x128xf32, #tpu.memory_space<vmem>>, vector<1x128xf32>
      %319 = vector.broadcast %318 : vector<1x128xf32> to vector<8x128xf32>
      %320 = arith.addf %317, %319 : vector<8x128xf32>
      %c0_79 = arith.constant 0 : index
      %c0_80 = arith.constant 0 : index
      %321 = vector.load %arg5[%c0_79, %c0_80] : memref<8x128xf32, #tpu.memory_space<vmem>>, vector<8x128xf32>
      tpu.vector_store %arg5[%c0_79, %c0_80], %320 {strides = array<i32>} : memref<8x128xf32, #tpu.memory_space<vmem>>, vector<8x128xf32>,
    } else {
    }
    return
  }
  func.func @transform_0(%arg0: i32) -> (i32, i32, i32) {
    %c0_i32 = arith.constant 0 : i32
    %c0_i32_0 = arith.constant 0 : i32
    %c0_i32_1 = arith.constant 0 : i32
    return %arg0, %c0_i32, %c0_i32_0 : i32, i32, i32
  }
  func.func @transform_1(%arg0: i32) -> (i32, i32) {
    %c0_i32 = arith.constant 0 : i32
    %c0_i32_0 = arith.constant 0 : i32
    %c0_i32_1 = arith.constant 0 : i32
    return %c0_i32, %c0_i32_0 : i32, i32
  }
  func.func @transform_2(%arg0: i32) -> (i32, i32) {
    %c0_i32 = arith.constant 0 : i32
    %c0_i32_0 = arith.constant 0 : i32
    %c0_i32_1 = arith.constant 0 : i32
    return %c0_i32, %c0_i32_0 : i32, i32
  }
  func.func @transform_3(%arg0: i32) -> (i32, i32) {
    %c0_i32 = arith.constant 0 : i32
    %c0_i32_0 = arith.constant 0 : i32
    %c0_i32_1 = arith.constant 0 : i32
    return %c0_i32, %c0_i32_0 : i32, i32
  }
  func.func @transform_4(%arg0: i32) -> (i32, i32) {
    %c0_i32 = arith.constant 0 : i32
    %c0_i32_0 = arith.constant 0 : i32
    %c0_i32_1 = arith.constant 0 : i32
    return %c0_i32, %c0_i32_0 : i32, i32
  }
}

</mosaic_0001>

<bundles_post_ra>
// kernel: tpu_custom_call.1
= control target key start
LH: loop header
LB: loop body
LE: loop exit
PB: predicated region body
PF: predicated region fallthrough
CT: control target
= control target key end

     0   :  { %9 = vsyncpa [#allocation6], 0  ;;  %s1702_s0 = inlined_call_operand.hbm [shape: f32[8,8,128], index: 0, kind: input, shape index: {}]   ;;  %s1703_s1 = inlined_call_operand.hbm [shape: f32[32,128], index: 1, kind: input, shape index: {}]   ;;  %s1704_s2 = inlined_call_operand.hbm [shape: f32[32,128], index: 2, kind: input, shape index: {}]   ;;  %s1705_s3 = inlined_call_operand.vmem [shape: f32[1,128], index: 3, kind: input, shape index: {}]   ;;  %s1706_s4 = inlined_call_operand.hbm [shape: f32[8,128], index: 4, kind: output, shape index: {}]  }
   0x1   :  { %10 = vsyncpa [#allocation9], 0 }
   0x2   :  { %11 = vsyncpa [#allocation7], 0  ;;  %s1474_s15 = smov [#allocation8]   ;;  %s1475_s17 = smov [#allocation5]  }
   0x3   :  { %s29_s16 = sshll.u32 %s1474_s15, 4  ;;  %s17_s18 = sshll.u32 %s1475_s17, 4  ;;  %s30_s16 = int_to_ptr.vmem [resolvable:$true] %s29_s16  ;;  %s1511_s18 = int_to_ptr.vmem [resolvable:$true] %s17_s18 }
   0x4   :  { %s1380_s21 = scalar_lea.hbm %s1703_s1, 512 }
   0x5   :  { %p1381_p0 = scmp.ne.s32.totalorder %s1703_s1, %s1380_s21  ;;  %p1384_p1 = scmp.lt.u32.totalorder %s1380_s21, %s1703_s1 }
   0x7   :  { %p1386_p2 = pnand %p1384_p1, %p1381_p0 }
   0x9   :  { %1389 = shalt.err (!%p1386_p2)
}
   0xa   :  { %s1390_s26 = scalar_lea.vmem %s30_s16, 512  ;;  %p1395_p4 = scmp.lt.s32.totalorder %s30_s16, %s30_s16 }
   0xb   :  { %p1391_p3 = scmp.ne.s32.totalorder %s30_s16, %s1390_s26  ;;  %p1396_p5 = scmp.lt.s32.totalorder %s1390_s26, %s1390_s26 }
   0xd   :  { %p1397_p6 = por %p1396_p5, %p1395_p4 }
   0xf   :  { %p1398_p7 = pnand %p1397_p6, %p1391_p3 }
  0x11   :  { %1401 = shalt.err (!%p1398_p7)
}
  0x12   :  { %s1476_s27 = smov 128   ;;  %s1477_s28 = smov 8  }
  0x13   :  { %35 = dma.hbm_to_vmem [thread:$0]  %s1703_s1, 512, %s30_s16, [#allocation9], %s1476_s27, %s1476_s27, %s1477_s28  }
  0x14   :  { %s1402_s7 = scalar_lea.hbm %s1702_s0, 1024 }
  0x15   :  { %p1403_p8 = scmp.ne.s32.totalorder %s1702_s0, %s1402_s7  ;;  %p1406_p9 = scmp.lt.u32.totalorder %s1402_s7, %s1702_s0 }
  0x17   :  { %p1408_p10 = pnand %p1406_p9, %p1403_p8 }
  0x19   :  { %1411 = shalt.err (!%p1408_p10)
}
  0x1a   :  { %s1412_s12 = scalar_lea.vmem %s1511_s18, 1024  ;;  %p1417_p12 = scmp.lt.s32.totalorder %s1511_s18, %s1511_s18 }
  0x1b   :  { %p1413_p11 = scmp.ne.s32.totalorder %s1511_s18, %s1412_s12  ;;  %p1418_p13 = scmp.lt.s32.totalorder %s1412_s12, %s1412_s12 }
  0x1d   :  { %p1419_p0 = por %p1418_p13, %p1417_p12 }
  0x1f   :  { %p1420_p1 = pnand %p1419_p0, %p1413_p11 }
  0x21   :  { %1423 = shalt.err (!%p1420_p1)
}
  0x22   :  { %23 = dma.hbm_to_vmem [thread:$0]  %s1702_s0, 1024, %s1511_s18, [#allocation6], %s1476_s27, %s1476_s27, %s1477_s28  }
  0x23   :  { %s1478_s14 = smov [#allocation10]   ;;  %s1424_s19 = scalar_lea.hbm %s1704_s2, 512 }
  0x24   :  { %s41_s15 = sshll.u32 %s1478_s14, 4  ;;  %p1425_p2 = scmp.ne.s32.totalorder %s1704_s2, %s1424_s19  ;;  %s42_s15 = int_to_ptr.vmem [resolvable:$true] %s41_s15 }
  0x25   :  { %p1428_p3 = scmp.lt.u32.totalorder %s1424_s19, %s1704_s2 }
  0x27   :  { %p1430_p4 = pnand %p1428_p3, %p1425_p2 }
  0x29   :  { %1433 = shalt.err (!%p1430_p4)
}
  0x2a   :  { %s1434_s24 = scalar_lea.vmem %s42_s15, 512  ;;  %p1439_p6 = scmp.lt.s32.totalorder %s42_s15, %s42_s15 }
  0x2b   :  { %p1435_p5 = scmp.ne.s32.totalorder %s42_s15, %s1434_s24  ;;  %p1440_p7 = scmp.lt.s32.totalorder %s1434_s24, %s1434_s24 }
  0x2d   :  { %p1441_p8 = por %p1440_p7, %p1439_p6 }
  0x2f   :  { %p1442_p9 = pnand %p1441_p8, %p1435_p5 }
  0x31   :  { %1445 = shalt.err (!%p1442_p9)
}
  0x32   :  { %47 = dma.hbm_to_vmem [thread:$0]  %s1704_s2, 512, %s42_s15, [#allocation9], %s1476_s27, %s1476_s27, %s1477_s28  }
  0x33   :  { %1468 = dma.done.wait [#allocation6], 1024  }
  0x34   :  { %1469 = vsyncadd [#allocation6], 4294966272 }
  0x35   :  { %1470 = dma.done.wait [#allocation9], 1024  }
  0x36   :  { %1471 = vsyncadd [#allocation9], 4294966272  ;;  %vm63_vm0 = vcmask 261120   ;;  %v1479_v0 = vmov 0.0|0.0   ;;  %vm1480_vm1 = vmmov 0   ;;  %v1481_v1 = vmov 0.0  }
  0x37   :  { %1250 = vmatprep.subr.bf16.mxu0 %v1479_v0  ;;  %1159 = vmatprep.mubr.msk.f32.mxu0 %vm1480_vm1, %v1481_v1  ;;  %64 = vst.msk [vmem:[#allocation2] sm:$0xff] %vm63_vm0, %v1481_v1  ;;  %65 = vst.msk [vmem:[#allocation3] sm:$0xff] %vm63_vm0, %v1481_v1  ;;  %v66_v2 = vld [vmem:[#allocation8] sm:$0xff]  ;;  %v67_v3 = vld [vmem:[#allocation8 + $0x8] sm:$0xff]  ;;  %s1482_s2 = smov 64   ;;  %s1483_s25 = smov 32   ;;  %v72_v52 = vlaneseq }
  0x38   :  { %1256 = vmatprep.subr.bf16.mxu1 %v1479_v0  ;;  %1170 = vmatprep.mubr.msk.f32.mxu1 %vm1480_vm1, %v1481_v1  ;;  %v68_v4 = vld [vmem:[#allocation8 + $0x10] sm:$0xff]  ;;  %v1573_v5 = vpack.c.bf16 %v67_v3, %v66_v2  ;;  %v69_v6 = vld [vmem:[#allocation8 + $0x18] sm:$0xff]  ;;  %v74_v9 = vld [vmem:[#allocation5] sm:$0xff]  ;;  %vm178_vm2 = vcmask 1048320   ;;  %s1484_s26 = smov 96   ;;  %s1485_s29 = smov [#allocation11]  }
  0x39   :  { %v1576_v7 = vpack.c.bf16 %v69_v6, %v68_v4  ;;  %v189_v29 = vld [vmem:[#allocation5 + $0x8] sm:$0xff]  ;;  %v1610_v56 = vshrl.u32 %v72_v52, 7  ;;  %v300_v3 = vld [vmem:[#allocation5 + $0x10] sm:$0xff]  ;;  %s1078_s30 = sshll.u32 %s1485_s29, 4  ;;  %s1079_s30 = int_to_ptr.vmem [resolvable:$true] %s1078_s30 }
  0x3a   :  { %1252 = vmatpush3.bf16.msra.mxu0 %v1573_v5  ;;  %1258 = vmatpush3.bf16.msra.mxu1 %v1573_v5  ;;  %s1446_s5 = scalar_lea.vmem %s1079_s30, 128  ;;  %p1451_p11 = scmp.lt.s32.totalorder %s1079_s30, %s1079_s30 }
  0x3b   :  { %1253 = vmatprep.subr.bf16.mxu0 %v1479_v0  ;;  %1259 = vmatprep.subr.bf16.mxu1 %v1479_v0  ;;  %vm186_vm3 = vcmp.eq.s32.totalorder %v1610_v56, 0  ;;  %vm297_vm4 = vcmp.eq.s32.totalorder %v1610_v56, 1  ;;  %vm408_vm5 = vcmp.eq.s32.totalorder %v1610_v56, 2  ;;  %vm519_vm6 = vcmp.eq.s32.totalorder %v1610_v56, 3  ;;  %p1447_p10 = scmp.ne.s32.totalorder %s1079_s30, %s1446_s5  ;;  %p1452_p12 = scmp.lt.s32.totalorder %s1446_s5, %s1446_s5 }
  0x3c   :  { %vm630_vm7 = vcmp.eq.s32.totalorder %v1610_v56, 4  ;;  %vm741_vm8 = vcmp.eq.s32.totalorder %v1610_v56, 5  ;;  %vm852_vm9 = vcmp.eq.s32.totalorder %v1610_v56, 6  ;;  %vm963_vm10 = vcmp.eq.s32.totalorder %v1610_v56, 7  ;;  %v1104_v56 = vld [vmem:[%s1705_s3] ss:$0 sm:$0xff] }
  0x3d   :  { %p1453_p13 = por %p1452_p12, %p1451_p11 }
  0x3e   :  { %1255 = vmatpush3.bf16.msra.mxu0 %v1576_v7  ;;  %v70_v8 = vld [vmem:[#allocation2] sm:$0xff]  ;;  %1261 = vmatpush3.bf16.msra.mxu1 %v1576_v7  ;;  %v71_v14 = vld [vmem:[#allocation3] sm:$0xff] }
  0x3f   :  { %1262 = vmatprep.subr.bf16.mxu0 %v1479_v0  ;;  %1268 = vmatprep.subr.bf16.mxu1 %v1479_v0  ;;  %p1454_p0 = pnand %p1453_p13, %p1447_p10 }
  0x41   :  { %1160 = vmatmul.mubr.msk.f32.vlgmr.msra.gmra.mrb[0].mxu0 %vm63_vm0, %v70_v8 }
  0x42   :  { %1264 = vmatpush3.bf16.msra.mxu0 %v1573_v5  ;;  %1181 = vmatprep.mubr.msk.f32.mxu0 %vm1480_vm1, %v1481_v1 }
  0x43   :  { %1265 = vmatprep.subr.bf16.mxu0 %v1479_v0 }
  0x46   :  { %1267 = vmatpush3.bf16.msra.mxu0 %v1576_v7 }
  0x47   :  { %1274 = vmatprep.subr.bf16.mxu0 %v1479_v0 }
 0x114   :  { %v145_v10 = vpop.f32.mrb[0].mxu0 }
 0x115   :  { %v149_v11 = vadd.f32 %v145_v10, %v74_v9  ;;  %v1161_v12 = vpop.f32.mrb[1].mxu0 }
 0x117   :  { %1316 = vtanh.f32 %v149_v11  ;;  %v1089_v15 = vmul.f32 -1.442695, %v149_v11 }
 0x119   :  { %1318 = vpow2.f32 %v1089_v15 }
 0x121   :  { %v1317_v13 = vpop.eup %1316 }
 0x122   :  { %163 = vrot.lane.b32.xlu0 %v1317_v13, %s1482_s2 }
 0x123   :  { %v1319_v16 = vpop.eup %1318 }
 0x124   :  { %v153_v17 = vadd.f32 1.0, %v1319_v16 }
 0x126   :  { %158 = vrot.lane.b32.xlu0 %v71_v14, %s1483_s25  ;;  %1320 = vrcp.f32 %v153_v17 }
 0x130   :  { %v1321_v18 = vpop.eup %1320 }
 0x194   :  { %v164_v19 = vpop.permute.xlu0 %163 }
 0x195   :  { %v166_v20 = vmul.f32 %v1321_v18, %v164_v19 }
 0x197   :  { %168 = vrot.lane.b32.xlu1 %v166_v20, %s1483_s25 }
 0x198   :  { %v159_v21 = vpop.permute.xlu0 %158 }
 0x199   :  { %v161_v22 = vmul.f32 %v1321_v18, %v159_v21 }
 0x209   :  { %v169_v23 = vpop.permute.xlu1 %168 }
 0x20a   :  { %v171_v24 = vadd.f32 %v169_v23, %v161_v22 }
 0x20c   :  { %1322 = vtanh.f32 %v171_v24 }
 0x216   :  { %v1323_v25 = vpop.eup %1322 }
 0x217   :  { %174 = vrot.lane.b32.xlu1 %v1323_v25, %s1482_s2 }
 0x289   :  { %v175_v26 = vpop.permute.xlu1 %174 }
 0x28a   :  { %v177_v27 = vmul.f32 %v1321_v18, %v175_v26 }
 0x28c   :  { %191 = vrot.lane.b32.xlu0 %v177_v27, %s1483_s25  ;;  %v179_v44 = vsel %vm178_vm2, %v177_v27, -inf }
 0x28d   :  { %v180_v45 = vrot.slane %v179_v44, 4 }
 0x28f   :  { %v181_v46 = vmax.f32 %v179_v44, %v180_v45 }
 0x291   :  { %v182_v47 = vrot.slane %v181_v46, 2 }
 0x293   :  { %v183_v50 = vmax.f32 %v181_v46, %v182_v47 }
 0x295   :  { %v184_v55 = vrot.slane %v183_v50, 1 }
 0x297   :  { %v185_v59 = vmax.f32 %v183_v50, %v184_v55 }
 0x299   :  { %v187_v62 = vsel %vm186_vm3, %v185_v59, 0.0 }
 0x2fe   :  { %v192_v28 = vpop.permute.xlu0 %191 }
 0x2ff   :  { %1171 = vmatmul.mubr.msk.f32.vlgmr.msra.gmra.mrb[0].mxu1 %vm63_vm0, %v192_v28 }
 0x300   :  { %1270 = vmatpush3.bf16.msra.mxu1 %v1573_v5  ;;  %1192 = vmatprep.mubr.msk.f32.mxu1 %vm1480_vm1, %v1481_v1 }
 0x301   :  { %1271 = vmatprep.subr.bf16.mxu1 %v1479_v0 }
 0x304   :  { %1273 = vmatpush3.bf16.msra.mxu1 %v1576_v7 }
 0x305   :  { %1280 = vmatprep.subr.bf16.mxu1 %v1479_v0 }
 0x3d2   :  { %v261_v30 = vpop.f32.mrb[0].mxu1 }
 0x3d3   :  { %v265_v31 = vadd.f32 %v261_v30, %v189_v29  ;;  %v1172_v32 = vpop.f32.mrb[1].mxu1 }
 0x3d5   :  { %1324 = vtanh.f32 %v265_v31  ;;  %v1091_v34 = vmul.f32 -1.442695, %v265_v31  ;;  %v411_v31 = vld [vmem:[#allocation5 + $0x18] sm:$0xff] }
 0x3d7   :  { %1326 = vpow2.f32 %v1091_v34 }
 0x3df   :  { %v1325_v33 = vpop.eup %1324 }
 0x3e0   :  { %275 = vrot.lane.b32.xlu1 %v1325_v33, %s1482_s2 }
 0x3e1   :  { %v1327_v35 = vpop.eup %1326 }
 0x3e2   :  { %v269_v36 = vadd.f32 1.0, %v1327_v35 }
 0x3e4   :  { %1328 = vrcp.f32 %v269_v36 }
 0x3ee   :  { %v1329_v37 = vpop.eup %1328 }
 0x3ef   :  { %v273_v40 = vmul.f32 %v1329_v37, %v171_v24 }
 0x452   :  { %v276_v38 = vpop.permute.xlu1 %275 }
 0x453   :  { %v278_v39 = vmul.f32 %v1329_v37, %v276_v38 }
 0x455   :  { %280 = vrot.lane.b32.xlu0 %v278_v39, %s1483_s25 }
 0x4c7   :  { %v281_v41 = vpop.permute.xlu0 %280 }
 0x4c8   :  { %v283_v42 = vadd.f32 %v281_v41, %v273_v40 }
 0x4ca   :  { %1330 = vtanh.f32 %v283_v42 }
 0x4d4   :  { %v1331_v43 = vpop.eup %1330 }
 0x4d5   :  { %286 = vrot.lane.b32.xlu1 %v1331_v43, %s1482_s2 }
 0x547   :  { %v287_v48 = vpop.permute.xlu1 %286 }
 0x548   :  { %v289_v49 = vmul.f32 %v1329_v37, %v287_v48 }
 0x54a   :  { %v290_v51 = vsel %vm178_vm2, %v289_v49, -inf  ;;  %302 = vrot.lane.b32.xlu0 %v289_v49, %s1483_s25 }
 0x54b   :  { %v291_v53 = vrot.slane %v290_v51, 4 }
 0x54d   :  { %v292_v54 = vmax.f32 %v290_v51, %v291_v53 }
 0x54f   :  { %v293_v57 = vrot.slane %v292_v54, 2 }
 0x551   :  { %v294_v58 = vmax.f32 %v292_v54, %v293_v57 }
 0x553   :  { %v295_v60 = vrot.slane %v294_v58, 1 }
 0x555   :  { %v296_v61 = vmax.f32 %v294_v58, %v295_v60  ;;  %v522_v58 = vld [vmem:[#allocation5 + $0x20] sm:$0xff] }
 0x557   :  { %v298_v63 = vsel %vm297_vm4, %v296_v61, %v187_v62 }
 0x5bc   :  { %v303_v2 = vpop.permute.xlu0 %302 }
 0x5bd   :  { %1182 = vmatmul.mubr.msk.f32.vlgmr.msra.gmra.mrb[2].mxu0 %vm63_vm0, %v303_v2 }
 0x5be   :  { %1276 = vmatpush3.bf16.msra.mxu0 %v1573_v5  ;;  %1203 = vmatprep.mubr.msk.f32.mxu0 %vm1480_vm1, %v1481_v1 }
 0x5bf   :  { %1277 = vmatprep.subr.bf16.mxu0 %v1479_v0 }
 0x5c2   :  { %1279 = vmatpush3.bf16.msra.mxu0 %v1576_v7 }
 0x5c3   :  { %1286 = vmatprep.subr.bf16.mxu0 %v1479_v0 }
 0x690   :  { %v372_v4 = vpop.f32.mrb[2].mxu0 }
 0x691   :  { %v376_v6 = vadd.f32 %v372_v4, %v300_v3  ;;  %v1183_v8 = vpop.f32.mrb[3].mxu0 }
 0x693   :  { %1332 = vtanh.f32 %v376_v6  ;;  %v1093_v10 = vmul.f32 -1.442695, %v376_v6 }
 0x695   :  { %1334 = vpow2.f32 %v1093_v10 }
 0x69d   :  { %v1333_v9 = vpop.eup %1332 }
 0x69e   :  { %386 = vrot.lane.b32.xlu1 %v1333_v9, %s1482_s2 }
 0x69f   :  { %v1335_v11 = vpop.eup %1334 }
 0x6a0   :  { %v380_v12 = vadd.f32 1.0, %v1335_v11 }
 0x6a2   :  { %1336 = vrcp.f32 %v380_v12 }
 0x6ac   :  { %v1337_v13 = vpop.eup %1336 }
 0x6ad   :  { %v384_v16 = vmul.f32 %v1337_v13, %v283_v42 }
 0x710   :  { %v387_v14 = vpop.permute.xlu1 %386 }
 0x711   :  { %v389_v15 = vmul.f32 %v1337_v13, %v387_v14 }
 0x713   :  { %391 = vrot.lane.b32.xlu0 %v389_v15, %s1483_s25 }
 0x785   :  { %v392_v17 = vpop.permute.xlu0 %391 }
 0x786   :  { %v394_v18 = vadd.f32 %v392_v17, %v384_v16 }
 0x788   :  { %1338 = vtanh.f32 %v394_v18 }
 0x792   :  { %v1339_v19 = vpop.eup %1338 }
 0x793   :  { %397 = vrot.lane.b32.xlu1 %v1339_v19, %s1482_s2 }
 0x805   :  { %v398_v20 = vpop.permute.xlu1 %397 }
 0x806   :  { %v400_v21 = vmul.f32 %v1337_v13, %v398_v20 }
 0x808   :  { %v401_v22 = vsel %vm178_vm2, %v400_v21, -inf  ;;  %413 = vrot.lane.b32.xlu0 %v400_v21, %s1483_s25 }
 0x809   :  { %v402_v23 = vrot.slane %v401_v22, 4 }
 0x80b   :  { %v403_v24 = vmax.f32 %v401_v22, %v402_v23 }
 0x80d   :  { %v404_v25 = vrot.slane %v403_v24, 2 }
 0x80f   :  { %v405_v26 = vmax.f32 %v403_v24, %v404_v25  ;;  %v633_v24 = vld [vmem:[#allocation5 + $0x28] sm:$0xff] }
 0x811   :  { %v406_v27 = vrot.slane %v405_v26, 1 }
 0x813   :  { %v407_v28 = vmax.f32 %v405_v26, %v406_v27 }
 0x815   :  { %v409_v29 = vsel %vm408_vm5, %v407_v28, %v298_v63 }
 0x87a   :  { %v414_v30 = vpop.permute.xlu0 %413 }
 0x87b   :  { %1193 = vmatmul.mubr.msk.f32.vlgmr.msra.gmra.mrb[2].mxu1 %vm63_vm0, %v414_v30 }
 0x87c   :  { %1282 = vmatpush3.bf16.msra.mxu1 %v1573_v5  ;;  %1214 = vmatprep.mubr.msk.f32.mxu1 %vm1480_vm1, %v1481_v1 }
 0x87d   :  { %1283 = vmatprep.subr.bf16.mxu1 %v1479_v0 }
 0x880   :  { %1285 = vmatpush3.bf16.msra.mxu1 %v1576_v7 }
 0x881   :  { %1292 = vmatprep.subr.bf16.mxu1 %v1479_v0 }
 0x94e   :  { %v483_v32 = vpop.f32.mrb[2].mxu1 }
 0x94f   :  { %v487_v33 = vadd.f32 %v483_v32, %v411_v31  ;;  %v1194_v34 = vpop.f32.mrb[3].mxu1 }
 0x951   :  { %1340 = vtanh.f32 %v487_v33  ;;  %v1095_v36 = vmul.f32 -1.442695, %v487_v33 }
 0x953   :  { %1342 = vpow2.f32 %v1095_v36 }
 0x95b   :  { %v1341_v35 = vpop.eup %1340 }
 0x95c   :  { %497 = vrot.lane.b32.xlu1 %v1341_v35, %s1482_s2 }
 0x95d   :  { %v1343_v37 = vpop.eup %1342 }
 0x95e   :  { %v491_v38 = vadd.f32 1.0, %v1343_v37 }
 0x960   :  { %1344 = vrcp.f32 %v491_v38 }
 0x96a   :  { %v1345_v39 = vpop.eup %1344 }
 0x96b   :  { %v495_v42 = vmul.f32 %v1345_v39, %v394_v18 }
 0x9ce   :  { %v498_v40 = vpop.permute.xlu1 %497 }
 0x9cf   :  { %v500_v41 = vmul.f32 %v1345_v39, %v498_v40 }
 0x9d1   :  { %502 = vrot.lane.b32.xlu0 %v500_v41, %s1483_s25 }
 0xa43   :  { %v503_v43 = vpop.permute.xlu0 %502 }
 0xa44   :  { %v505_v44 = vadd.f32 %v503_v43, %v495_v42 }
 0xa46   :  { %1346 = vtanh.f32 %v505_v44 }
 0xa50   :  { %v1347_v45 = vpop.eup %1346 }
 0xa51   :  { %508 = vrot.lane.b32.xlu1 %v1347_v45, %s1482_s2 }
 0xac3   :  { %v509_v46 = vpop.permute.xlu1 %508 }
 0xac4   :  { %v511_v47 = vmul.f32 %v1345_v39, %v509_v46 }
 0xac6   :  { %v512_v48 = vsel %vm178_vm2, %v511_v47, -inf  ;;  %524 = vrot.lane.b32.xlu0 %v511_v47, %s1483_s25 }
 0xac7   :  { %v513_v49 = vrot.slane %v512_v48, 4 }
 0xac9   :  { %v514_v50 = vmax.f32 %v512_v48, %v513_v49  ;;  %v744_v48 = vld [vmem:[#allocation5 + $0x30] sm:$0xff] }
 0xacb   :  { %v515_v51 = vrot.slane %v514_v50, 2 }
 0xacd   :  { %v516_v52 = vmax.f32 %v514_v50, %v515_v51 }
 0xacf   :  { %v517_v53 = vrot.slane %v516_v52, 1 }
 0xad1   :  { %v518_v54 = vmax.f32 %v516_v52, %v517_v53 }
 0xad3   :  { %v520_v55 = vsel %vm519_vm6, %v518_v54, %v409_v29 }
 0xb38   :  { %v525_v57 = vpop.permute.xlu0 %524 }
 0xb39   :  { %1204 = vmatmul.mubr.msk.f32.vlgmr.msra.gmra.mrb[4].mxu0 %vm63_vm0, %v525_v57 }
 0xb3a   :  { %1288 = vmatpush3.bf16.msra.mxu0 %v1573_v5  ;;  %1225 = vmatprep.mubr.msk.f32.mxu0 %vm1480_vm1, %v1481_v1 }
 0xb3b   :  { %1289 = vmatprep.subr.bf16.mxu0 %v1479_v0 }
 0xb3e   :  { %1291 = vmatpush3.bf16.msra.mxu0 %v1576_v7 }
 0xb3f   :  { %1298 = vmatprep.subr.bf16.mxu0 %v1479_v0 }
 0xc0c   :  { %v594_v59 = vpop.f32.mrb[4].mxu0 }
 0xc0d   :  { %v598_v60 = vadd.f32 %v594_v59, %v522_v58  ;;  %v1205_v61 = vpop.f32.mrb[5].mxu0 }
 0xc0f   :  { %1348 = vtanh.f32 %v598_v60  ;;  %v1097_v63 = vmul.f32 -1.442695, %v598_v60 }
 0xc11   :  { %1350 = vpow2.f32 %v1097_v63 }
 0xc19   :  { %v1349_v62 = vpop.eup %1348 }
 0xc1a   :  { %608 = vrot.lane.b32.xlu1 %v1349_v62, %s1482_s2 }
 0xc1b   :  { %v1351_v2 = vpop.eup %1350 }
 0xc1c   :  { %v602_v3 = vadd.f32 1.0, %v1351_v2 }
 0xc1e   :  { %1352 = vrcp.f32 %v602_v3 }
 0xc28   :  { %v1353_v4 = vpop.eup %1352 }
 0xc29   :  { %v606_v9 = vmul.f32 %v1353_v4, %v505_v44 }
 0xc8c   :  { %v609_v6 = vpop.permute.xlu1 %608 }
 0xc8d   :  { %v611_v8 = vmul.f32 %v1353_v4, %v609_v6 }
 0xc8f   :  { %613 = vrot.lane.b32.xlu0 %v611_v8, %s1483_s25 }
 0xd01   :  { %v614_v10 = vpop.permute.xlu0 %613 }
 0xd02   :  { %v616_v11 = vadd.f32 %v614_v10, %v606_v9 }
 0xd04   :  { %1354 = vtanh.f32 %v616_v11 }
 0xd0e   :  { %v1355_v12 = vpop.eup %1354 }
 0xd0f   :  { %619 = vrot.lane.b32.xlu1 %v1355_v12, %s1482_s2 }
 0xd81   :  { %v620_v13 = vpop.permute.xlu1 %619 }
 0xd82   :  { %v622_v14 = vmul.f32 %v1353_v4, %v620_v13 }
 0xd84   :  { %v623_v15 = vsel %vm178_vm2, %v622_v14, -inf  ;;  %635 = vrot.lane.b32.xlu0 %v622_v14, %s1483_s25  ;;  %v855_v14 = vld [vmem:[#allocation5 + $0x38] sm:$0xff] }
 0xd85   :  { %v624_v16 = vrot.slane %v623_v15, 4 }
 0xd87   :  { %v625_v17 = vmax.f32 %v623_v15, %v624_v16 }
 0xd89   :  { %v626_v18 = vrot.slane %v625_v17, 2 }
 0xd8b   :  { %v627_v19 = vmax.f32 %v625_v17, %v626_v18 }
 0xd8d   :  { %v628_v20 = vrot.slane %v627_v19, 1 }
 0xd8f   :  { %v629_v21 = vmax.f32 %v627_v19, %v628_v20 }
 0xd91   :  { %v631_v22 = vsel %vm630_vm7, %v629_v21, %v520_v55 }
 0xdf6   :  { %v636_v23 = vpop.permute.xlu0 %635 }
 0xdf7   :  { %1215 = vmatmul.mubr.msk.f32.vlgmr.msra.gmra.mrb[4].mxu1 %vm63_vm0, %v636_v23 }
 0xdf8   :  { %1294 = vmatpush3.bf16.msra.mxu1 %v1573_v5  ;;  %1236 = vmatprep.mubr.msk.f32.mxu1 %vm1480_vm1, %v1481_v1 }
 0xdf9   :  { %1295 = vmatprep.subr.bf16.mxu1 %v1479_v0 }
 0xdfc   :  { %1297 = vmatpush3.bf16.msra.mxu1 %v1576_v7 }
 0xeca   :  { %v705_v25 = vpop.f32.mrb[4].mxu1 }
 0xecb   :  { %v709_v26 = vadd.f32 %v705_v25, %v633_v24  ;;  %v1216_v27 = vpop.f32.mrb[5].mxu1 }
 0xecd   :  { %1356 = vtanh.f32 %v709_v26  ;;  %v1099_v29 = vmul.f32 -1.442695, %v709_v26 }
 0xecf   :  { %1358 = vpow2.f32 %v1099_v29 }
 0xed7   :  { %v1357_v28 = vpop.eup %1356 }
 0xed8   :  { %719 = vrot.lane.b32.xlu1 %v1357_v28, %s1482_s2 }
 0xed9   :  { %v1359_v30 = vpop.eup %1358 }
 0xeda   :  { %v713_v31 = vadd.f32 1.0, %v1359_v30 }
 0xedc   :  { %1360 = vrcp.f32 %v713_v31 }
 0xee6   :  { %v1361_v5 = vpop.eup %1360 }
 0xee7   :  { %v717_v34 = vmul.f32 %v1361_v5, %v616_v11 }
 0xf4a   :  { %v720_v32 = vpop.permute.xlu1 %719 }
 0xf4b   :  { %v722_v33 = vmul.f32 %v1361_v5, %v720_v32  ;;  %v987_v32 = vld [vmem:[#allocation10] sm:$0xff] }
 0xf4d   :  { %724 = vrot.lane.b32.xlu0 %v722_v33, %s1483_s25  ;;  %v988_v33 = vld [vmem:[#allocation10 + $0x8] sm:$0xff] }
 0xfbf   :  { %v725_v7 = vpop.permute.xlu0 %724 }
 0xfc0   :  { %v727_v35 = vadd.f32 %v725_v7, %v717_v34  ;;  %v1299_v34 = vpack.c.bf16 %v988_v33, %v987_v32 }
 0xfc2   :  { %1362 = vtanh.f32 %v727_v35 }
 0xfcc   :  { %v1363_v36 = vpop.eup %1362 }
 0xfcd   :  { %730 = vrot.lane.b32.xlu1 %v1363_v36, %s1482_s2  ;;  %v989_v36 = vld [vmem:[#allocation10 + $0x10] sm:$0xff] }
0x103f   :  { %v731_v37 = vpop.permute.xlu1 %730 }
0x1040   :  { %v733_v38 = vmul.f32 %v1361_v5, %v731_v37  ;;  %v990_v37 = vld [vmem:[#allocation10 + $0x18] sm:$0xff] }
0x1042   :  { %v734_v39 = vsel %vm178_vm2, %v733_v38, -inf  ;;  %746 = vrot.lane.b32.xlu0 %v733_v38, %s1483_s25  ;;  %v1302_v38 = vpack.c.bf16 %v990_v37, %v989_v36 }
0x1043   :  { %v735_v40 = vrot.slane %v734_v39, 4 }
0x1045   :  { %v736_v41 = vmax.f32 %v734_v39, %v735_v40 }
0x1047   :  { %v737_v42 = vrot.slane %v736_v41, 2 }
0x1049   :  { %v738_v43 = vmax.f32 %v736_v41, %v737_v42 }
0x104b   :  { %v739_v44 = vrot.slane %v738_v43, 1 }
0x104d   :  { %v740_v45 = vmax.f32 %v738_v43, %v739_v44 }
0x104f   :  { %v742_v46 = vsel %vm741_vm8, %v740_v45, %v631_v22 }
0x10b4   :  { %v747_v47 = vpop.permute.xlu0 %746 }
0x10b5   :  { %1226 = vmatmul.mubr.msk.f32.vlgmr.msra.gmra.mrb[6].mxu0 %vm63_vm0, %v747_v47 }
0x10b6   :  { %1247 = vmatprep.mubr.msk.f32.mxu0 %vm1480_vm1, %v1481_v1  ;;  %1300 = vmatpush3.bf16.msra.mxu0 %v1299_v34 }
0x10b7   :  { %1301 = vmatprep.subr.bf16.mxu0 %v1479_v0 }
0x10ba   :  { %1303 = vmatpush3.bf16.msra.mxu0 %v1302_v38 }
0x1188   :  { %v816_v49 = vpop.f32.mrb[6].mxu0 }
0x1189   :  { %v820_v50 = vadd.f32 %v816_v49, %v744_v48  ;;  %v1227_v51 = vpop.f32.mrb[7].mxu0 }
0x118b   :  { %1364 = vtanh.f32 %v820_v50  ;;  %v1101_v53 = vmul.f32 -1.442695, %v820_v50 }
0x118d   :  { %1366 = vpow2.f32 %v1101_v53 }
0x1195   :  { %v1365_v52 = vpop.eup %1364 }
0x1196   :  { %830 = vrot.lane.b32.xlu1 %v1365_v52, %s1482_s2 }
0x1197   :  { %v1367_v54 = vpop.eup %1366 }
0x1198   :  { %v824_v55 = vadd.f32 1.0, %v1367_v54 }
0x119a   :  { %1368 = vrcp.f32 %v824_v55 }
0x11a4   :  { %v1369_v57 = vpop.eup %1368 }
0x11a5   :  { %v828_v60 = vmul.f32 %v1369_v57, %v727_v35 }
0x1208   :  { %v831_v58 = vpop.permute.xlu1 %830 }
0x1209   :  { %v833_v59 = vmul.f32 %v1369_v57, %v831_v58 }
0x120b   :  { %835 = vrot.lane.b32.xlu0 %v833_v59, %s1483_s25 }
0x127d   :  { %v836_v1 = vpop.permute.xlu0 %835 }
0x127e   :  { %v838_v61 = vadd.f32 %v836_v1, %v828_v60 }
0x1280   :  { %1370 = vtanh.f32 %v838_v61 }
0x128a   :  { %v1371_v62 = vpop.eup %1370 }
0x128b   :  { %841 = vrot.lane.b32.xlu1 %v1371_v62, %s1482_s2 }
0x12fd   :  { %v842_v63 = vpop.permute.xlu1 %841 }
0x12fe   :  { %v844_v2 = vmul.f32 %v1369_v57, %v842_v63 }
0x1300   :  { %v845_v3 = vsel %vm178_vm2, %v844_v2, -inf  ;;  %857 = vrot.lane.b32.xlu0 %v844_v2, %s1483_s25 }
0x1301   :  { %v846_v4 = vrot.slane %v845_v3, 4 }
0x1303   :  { %v847_v6 = vmax.f32 %v845_v3, %v846_v4 }
0x1305   :  { %v848_v8 = vrot.slane %v847_v6, 2 }
0x1307   :  { %v849_v9 = vmax.f32 %v847_v6, %v848_v8 }
0x1309   :  { %v850_v10 = vrot.slane %v849_v9, 1 }
0x130b   :  { %v851_v11 = vmax.f32 %v849_v9, %v850_v10 }
0x130d   :  { %v853_v12 = vsel %vm852_vm9, %v851_v11, %v742_v46 }
0x1372   :  { %v858_v13 = vpop.permute.xlu0 %857 }
0x1373   :  { %1237 = vmatmul.mubr.msk.f32.vlgmr.msra.gmra.mrb[6].mxu1 %vm63_vm0, %v858_v13 }
0x1446   :  { %v927_v15 = vpop.f32.mrb[6].mxu1 }
0x1447   :  { %v931_v16 = vadd.f32 %v927_v15, %v855_v14  ;;  %v1238_v17 = vpop.f32.mrb[7].mxu1 }
0x1449   :  { %1372 = vtanh.f32 %v931_v16  ;;  %v1103_v19 = vmul.f32 -1.442695, %v931_v16 }
0x144b   :  { %1374 = vpow2.f32 %v1103_v19 }
0x1453   :  { %v1373_v18 = vpop.eup %1372 }
0x1454   :  { %941 = vrot.lane.b32.xlu1 %v1373_v18, %s1482_s2 }
0x1455   :  { %v1375_v20 = vpop.eup %1374 }
0x1456   :  { %v935_v21 = vadd.f32 1.0, %v1375_v20 }
0x1458   :  { %1376 = vrcp.f32 %v935_v21 }
0x1462   :  { %v1377_v22 = vpop.eup %1376 }
0x1463   :  { %v939_v25 = vmul.f32 %v1377_v22, %v838_v61 }
0x14c6   :  { %v942_v23 = vpop.permute.xlu1 %941 }
0x14c7   :  { %v944_v24 = vmul.f32 %v1377_v22, %v942_v23 }
0x14c9   :  { %946 = vrot.lane.b32.xlu0 %v944_v24, %s1483_s25 }
0x153b   :  { %v947_v26 = vpop.permute.xlu0 %946 }
0x153c   :  { %v949_v27 = vadd.f32 %v947_v26, %v939_v25 }
0x153e   :  { %1378 = vtanh.f32 %v949_v27 }
0x1548   :  { %v1379_v28 = vpop.eup %1378 }
0x1549   :  { %952 = vrot.lane.b32.xlu1 %v1379_v28, %s1482_s2 }
0x15bb   :  { %v953_v29 = vpop.permute.xlu1 %952 }
0x15bc   :  { %v955_v30 = vmul.f32 %v1377_v22, %v953_v29 }
0x15be   :  { %v956_v31 = vsel %vm178_vm2, %v955_v30, -inf  ;;  %966 = vrot.lane.b32.xlu1 %v955_v30, %s1483_s25 }
0x15bf   :  { %v957_v5 = vrot.slane %v956_v31, 4 }
0x15c1   :  { %v958_v7 = vmax.f32 %v956_v31, %v957_v5 }
0x15c3   :  { %v959_v35 = vrot.slane %v958_v7, 2 }
0x15c5   :  { %v960_v39 = vmax.f32 %v958_v7, %v959_v35 }
0x15c7   :  { %v961_v40 = vrot.slane %v960_v39, 1 }
0x15c9   :  { %v962_v41 = vmax.f32 %v960_v39, %v961_v40 }
0x15cb   :  { %v964_v42 = vsel %vm963_vm10, %v962_v41, %v853_v12 }
0x15cc   :  { %977 = vrot.lane.b32.xlu0 %v964_v42, %s1483_s25 }
0x15d0   :  { %971 = vrot.lane.b32.xlu0 %v949_v27, %s1484_s26 }
0x1630   :  { %v967_v43 = vpop.permute.xlu1 %966 }
0x1631   :  { %969 = vst.msk [vmem:[#allocation2] sm:$0xff] %vm63_vm0, %v967_v43 }
0x163e   :  { %v978_v44 = vpop.permute.xlu0 %977 }
0x163f   :  { %981 = vst.msk [vmem:[#allocation4] sm:$0xff] %vm63_vm0, %v978_v44 }
0x1642   :  { %v972_v0 = vpop.permute.xlu0 %971 }
0x1643   :  { %974 = vst.msk [vmem:[#allocation3] sm:$0xff] %vm63_vm0, %v972_v0 }
0x1646   :  { %v985_v45 = vld [vmem:[#allocation4] sm:$0xff] }
0x1647   :  { %v986_v46 = vmax.f32 %v985_v45, 0.0 }
0x1649   :  { %1248 = vmatmul.mubr.msk.f32.vlgmr.msra.gmra.mrb[8].mxu0 %vm63_vm0, %v986_v46 }
0x171c   :  { %v1067_v47 = vpop.f32.mrb[8].mxu0 }
0x171d   :  { %v1068_v48 = vadd.f32 %v1104_v56, %v1067_v47  ;;  %v1249_v49 = vpop.f32.mrb[9].mxu0 }
0x171f   :  { %1071 = vst [vmem:[#allocation11] sm:$0xff] %v1068_v48 }
0x1720   :  { %1457 = shalt.err (!%p1454_p0)
}
0x1721   :  { %s1458_s8 = scalar_lea.hbm %s1706_s4, 128 }
0x1722   :  { %p1459_p1 = scmp.ne.s32.totalorder %s1706_s4, %s1458_s8  ;;  %p1462_p2 = scmp.lt.u32.totalorder %s1458_s8, %s1706_s4 }
0x1724   :  { %p1464_p3 = pnand %p1462_p2, %p1459_p1 }
0x1726   :  { %1467 = shalt.err (!%p1464_p3)
}
0x1727   :  { %1081 = dma.vmem_to_hbm [thread:$0]  %s1079_s30, 128, %s1706_s4, [#allocation7]  }
0x1728   :  { %1472 = dma.done.wait [#allocation7], 128  }
0x1729   :  { %1473 = vsyncadd [#allocation7], 4294967168 }
0x172a   :  { %1085 = vsyncpa [#allocation6], 1 }
0x172b   :  { %1086 = vsyncpa [#allocation9], 1 }
0x172c   :  { %1087 = vsyncpa [#allocation7], 1 }

</bundles_post_ra>
